<compile_context>
chip_gen: v6e
topology: v6e:2x2x1
jax: 0.10.0
libtpu: 0.0.40
codegen_flags: <defaults>
</compile_context>

<pallas_src>
import functools

import numpy as np
import jax
import jax.numpy as jnp
from jax import lax
from jax.experimental import pallas as pl
from jax.experimental.pallas import tpu as pltpu


def _round_up(x, m):
    return (x + m - 1) // m * m


# ---------------------------------------------------------------------------
# Pallas kernel: one (OHk, OWCp) output plane per grid step.  All phases share
# this kernel; per-phase (d, h) tap offsets come from the SMEM prefetch table.
# ---------------------------------------------------------------------------
def _deconv_kernel(tbl_ref, x_ref, w_ref, o_ref, *, Tdh, OH, WpC, cast_bf16):
    """tbl_ref: (P*Tdh*2,) int32 SMEM  per-phase (d_off, h_off) tap table
       x_ref:   (Dp, Hp, Wp*Cin)       padded input, one batch element
       w_ref:   (Tdh*Wp*Cin, OWCp)     per-phase block-Toeplitz weights
       o_ref:   (OHk, OWCp)            one lane/sublane-dense output plane
    """
    ph = pl.program_id(1)
    od = pl.program_id(2)
    base = ph * (Tdh * 2)
    parts = []
    for t in range(Tdh):                      # static loop, Tdh <= ceil(K/s)^2
        d_off = tbl_ref[base + 2 * t]
        h_off = tbl_ref[base + 2 * t + 1]
        sl = x_ref[pl.ds(od + d_off, 1), pl.ds(h_off, OH), :]
        parts.append(sl.reshape(OH, WpC))
    lhs = parts[0] if Tdh == 1 else jnp.concatenate(parts, axis=-1)
    if cast_bf16:
        lhs = lhs.astype(jnp.bfloat16)        # bf16 MXU feed, f32 accumulation
    o_ref[...] = jnp.dot(lhs, w_ref[...], preferred_element_type=jnp.float32)


# ---------------------------------------------------------------------------
# Sub-pixel (phase) bookkeeping for ConvTranspose:
#   y[o] = sum_{i, k : i*s + k*d - p == o} x[i] * w[k]
# Outputs at offset ost = o mod s form a stride-1 correlation of the original
# x (left-padded by PL) with the reversed tap subset {k : k*d % s == r},
# r = (ost + p) % s, tap spacing d' = d / gcd(d, s), base index b0.
# ---------------------------------------------------------------------------
def _dim_info(size, K, s, p, d):
    out_full = (size - 1) * s - 2 * p + d * (K - 1) + 1
    phases = []
    for ost in range(s):
        r = (ost + p) % s
        taps = [k for k in range(K) if (k * d) % s == r]
        q_lo = -((r - p) // s)                        # ceil((p - r) / s)
        if taps:
            offs = [(k * d - r) // s for k in taps]
            dpr = offs[1] - offs[0] if len(offs) > 1 else 1
            pad_l = max(0, offs[-1] - q_lo)
        else:
            offs, dpr, pad_l = [], 1, 0
        phases.append(dict(taps=taps, offs=offs, T=len(taps), dpr=dpr,
                           q_lo=q_lo, pad_l=pad_l))
    PL = max(ph['pad_l'] for ph in phases)
    for ph in phases:
        ph['b0'] = (ph['q_lo'] - ph['offs'][-1] + PL) if ph['T'] else 0
    Omax = (out_full + s - 1) // s
    return dict(size=size, out_full=out_full, phases=phases, PL=PL, Omax=Omax)


def _padded_extent(dim, n_out):
    """Smallest padded extent so every tap read for n_out outputs stays in bounds."""
    reqs = [dim['size'] + dim['PL']]
    for ph in dim['phases']:
        if ph['T']:
            reqs.append(n_out - 1 + ph['b0'] + (ph['T'] - 1) * ph['dpr'] + 1)
    return max(reqs)


def _build_layer(in_spatial, Cin, Cout, K, s, p, d, w_np, use_bf16):
    """Precompute (once, at __init__) all per-layer constants and Toeplitz weights."""
    D, H, W = in_spatial
    dd = _dim_info(D, K, s, p, d)
    dh = _dim_info(H, K, s, p, d)
    dw = _dim_info(W, K, s, p, d)

    # Uniform tap count across phases (short phases padded with zero weights).
    Tm = max(max(ph['T'] for ph in dim['phases']) for dim in (dd, dh, dw))
    Tdh = Tm * Tm
    ODm, OHm, OWm = dd['Omax'], dh['Omax'], dw['Omax']
    OHk = _round_up(max(OHm, 1), 8)                    # sublane-dense output rows

    Dp = _padded_extent(dd, ODm)
    Hp = _round_up(_padded_extent(dh, OHk), 8)
    Wp = _padded_extent(dw, OWm)
    WpC = Wp * Cin
    KC = Tdh * WpC
    OWCp = _round_up(max(OWm * Cout, 1), 128)          # lane-dense output slab
    P = s ** 3

    # Block-Toeplitz weights (kw and Cin folded into one contraction) and the
    # per-phase (d, h) tap-offset table.
    w_t = np.transpose(w_np.astype(np.float32), (2, 3, 4, 0, 1))  # (K,K,K,Cin,Cout)
    w_toe = np.zeros((P, KC, OWCp), np.float32)
    tbl = np.zeros((P, Tdh, 2), np.int32)
    for i_d, phd in enumerate(dd['phases']):
        for i_h, phh in enumerate(dh['phases']):
            for i_w, phw in enumerate(dw['phases']):
                pi = (i_d * s + i_h) * s + i_w
                for md in range(phd['T']):
                    kd = phd['taps'][phd['T'] - 1 - md]
                    for mh in range(phh['T']):
                        kh = phh['taps'][phh['T'] - 1 - mh]
                        t = md * Tm + mh
                        tbl[pi, t, 0] = phd['b0'] + md * phd['dpr']
                        tbl[pi, t, 1] = phh['b0'] + mh * phh['dpr']
                        for mw in range(phw['T']):
                            kw = phw['taps'][phw['T'] - 1 - mw]
                            blk = w_t[kd, kh, kw]                   # (Cin, Cout)
                            for ow in range(OWm):
                                row = t * WpC + (phw['b0'] + ow + mw * phw['dpr']) * Cin
                                w_toe[pi, row:row + Cin,
                                      ow * Cout:(ow + 1) * Cout] = blk

    cdtype = jnp.bfloat16 if use_bf16 else jnp.float32
    isz = 2 if use_bf16 else 4
    xb = Dp * Hp * WpC * 4            # input kept f32 (small); LHS cast in-kernel
    wb = KC * OWCp * isz
    ob = OHk * OWCp * 4
    vmem_limit = int(min(96 * 2 ** 20,
                         max(32 * 2 ** 20, 2 * (xb + wb + ob) + (8 << 20))))

    return dict(
        D=D, H=H, W=W, Cin=Cin, Cout=Cout, s=s, P=P,
        PLd=dd['PL'], PLh=dh['PL'], PLw=dw['PL'],
        Dp=Dp, Hp=Hp, Wp=Wp, WpC=WpC, KC=KC,
        ODm=ODm, OHm=OHm, OWm=OWm, OHk=OHk, OWCp=OWCp, Tdh=Tdh,
        ODf=dd['out_full'], OHf=dh['out_full'], OWf=dw['out_full'],
        tbl=jnp.asarray(tbl.reshape(-1)),
        w_toe=jnp.asarray(w_toe, dtype=cdtype),
        use_bf16=use_bf16, vmem_limit=vmem_limit)


def _apply_layer(x, L):
    """One ConvTranspose3d layer (bias=False). x: (N, Cin, D, H, W) float32."""
    N = x.shape[0]
    s, Cout = L['s'], L['Cout']
    x_cl = jnp.transpose(x, (0, 2, 3, 4, 1))            # (N, D, H, W, Cin)
    xp = jnp.pad(x_cl, ((0, 0),
                        (L['PLd'], L['Dp'] - L['D'] - L['PLd']),
                        (L['PLh'], L['Hp'] - L['H'] - L['PLh']),
                        (L['PLw'], L['Wp'] - L['W'] - L['PLw']),
                        (0, 0)))
    xp = xp.reshape(N, L['Dp'], L['Hp'], L['WpC'])      # (W, Cin) folded into lanes

    kernel = functools.partial(_deconv_kernel, Tdh=L['Tdh'], OH=L['OHk'],
                               WpC=L['WpC'], cast_bf16=L['use_bf16'])
    y = pl.pallas_call(
        kernel,
        out_shape=jax.ShapeDtypeStruct(
            (N, L['P'], L['ODm'], L['OHk'], L['OWCp']), jnp.float32),
        grid_spec=pltpu.PrefetchScalarGridSpec(
            num_scalar_prefetch=1,
            grid=(N, L['P'], L['ODm']),
            in_specs=[
                # full padded volume per batch element (fetched once per n)
                pl.BlockSpec((None, L['Dp'], L['Hp'], L['WpC']),
                             lambda n, ph, od, tbl: (n, 0, 0, 0)),
                # per-phase Toeplitz weight slab (resident across the OD axis)
                pl.BlockSpec((None, L['KC'], L['OWCp']),
                             lambda n, ph, od, tbl: (ph, 0, 0)),
            ],
            out_specs=pl.BlockSpec((None, None, None, L['OHk'], L['OWCp']),
                                   lambda n, ph, od, tbl: (n, ph, od, 0, 0)),
        ),
        compiler_params=pltpu.CompilerParams(
            dimension_semantics=("parallel", "parallel", "parallel"),
            vmem_limit_bytes=L['vmem_limit']),
    )(L['tbl'], xp, L['w_toe'])

    # Un-pad, split phases and interleave them into the strided full output with
    # one reshape/transpose (contiguous writes, no strided HBM scatters).
    y = y[:, :, :, :L['OHm'], :L['OWm'] * Cout]
    y = y.reshape(N, s, s, s, L['ODm'], L['OHm'], L['OWm'], Cout)
    y = jnp.transpose(y, (0, 7, 4, 1, 5, 2, 6, 3))
    y = y.reshape(N, Cout, L['ODm'] * s, L['OHm'] * s, L['OWm'] * s)
    return y[:, :, :L['ODf'], :L['OHf'], :L['OWf']]


def _conv_transpose3d_ref(x, w, *, stride, padding, dilation):
    """Pure-JAX reference with PyTorch ConvTranspose3d semantics (bias=False)."""
    K = w.shape[2]
    pp = dilation * (K - 1) - padding
    w_conv = jnp.transpose(w[:, :, ::-1, ::-1, ::-1], (1, 0, 2, 3, 4))
    return lax.conv_general_dilated(
        x, w_conv,
        window_strides=(1, 1, 1),
        padding=[(pp, pp)] * 3,
        lhs_dilation=(stride,) * 3,
        rhs_dilation=(dilation,) * 3,
        dimension_numbers=("NCDHW", "OIDHW", "NCDHW"))


class DeConv3dTestPallas:
    """JAX/Pallas equivalent of DeConv3dTestTorch (bias=False ConvTranspose3d stack)."""

    def __init__(self, num_layers, ndim, shape, in_channels, out_channels,
                 kernel_size, stride, padding, dilation, key, use_bf16=False):
        assert ndim == 3
        self.shape = tuple(shape)
        self.stride, self.padding, self.dilation = stride, padding, dilation
        self.use_bf16 = use_bf16
        self.weights = []
        self.layers = []
        cur = tuple(shape)
        cin = in_channels
        for _ in range(num_layers):
            key, sub = jax.random.split(key)
            # ConvTranspose3d weight layout: (in_channels, out_channels, kD, kH, kW)
            w = 0.1 * jax.random.normal(
                sub, (cin, out_channels, kernel_size, kernel_size, kernel_size),
                dtype=jnp.float32)
            self.weights.append(w)
            L = _build_layer(cur, cin, out_channels, kernel_size,
                             stride, padding, dilation, np.asarray(w), use_bf16)
            self.layers.append(L)
            cur = (L['ODf'], L['OHf'], L['OWf'])
            cin = out_channels
        self._forward = jax.jit(self._forward_impl)
        self._reference = jax.jit(self._reference_impl)

    def _forward_impl(self, x):
        x = x.astype(jnp.float32)
        for L in self.layers:
            x = _apply_layer(x, L)
        return x

    def _reference_impl(self, x):
        x = x.astype(jnp.float32)
        for w in self.weights:
            x = _conv_transpose3d_ref(x, w, stride=self.stride,
                                      padding=self.padding,
                                      dilation=self.dilation)
        return x

    def __call__(self, x):
        return self._forward(x)

    def reference(self, x):
        return self._reference(x)


if __name__ == "__main__":
    key = jax.random.PRNGKey(0)
    key, kx = jax.random.split(key)

    # small config: 2 layers, 4->8 channels, 4^3 spatial, k=3, stride=2, pad=1, dil=1
    num_layers = 2
    shape = (4, 4, 4)
    in_channels, out_channels = 4, 8
    kernel_size, stride, padding, dilation = 3, 2, 1, 1

    model = DeConv3dTestPallas(num_layers, 3, shape, in_channels, out_channels,
                               kernel_size, stride, padding, dilation, key)

    x = jax.random.normal(kx, (2, in_channels) + shape, dtype=jnp.float32)

    y = jax.block_until_ready(model(x))
    y_ref = jax.block_until_ready(model.reference(x))
    np.testing.assert_allclose(np.asarray(y), np.asarray(y_ref), rtol=1e-4, atol=1e-4)

    # bf16 weight/LHS fast path (v6e/v7x MXU-native, f32 accumulation); same
    # weights (same key), looser tolerance as recommended by the perf review.
    model_bf16 = DeConv3dTestPallas(num_layers, 3, shape, in_channels, out_channels,
                                    kernel_size, stride, padding, dilation, key,
                                    use_bf16=True)
    y_bf16 = jax.block_until_ready(model_bf16(x))
    np.testing.assert_allclose(np.asarray(y_bf16), np.asarray(y_ref),
                               rtol=5e-2, atol=5e-2)

    print("KERNEL_OK")
</pallas_src>

<mosaic_0001>
module attributes {stable_mosaic.version = 11 : i64} {
  func.func @_deconv_kernel(%arg0: i32, %arg1: i32, %arg2: i32, %arg3: memref<64xi32, #tpu.memory_space<smem>>, %arg4: memref<1x5x16x20xf32, #tpu.memory_space<vmem>>, %arg5: memref<1x80x128xf32, #tpu.memory_space<vmem>>, %arg6: memref<1x1x1x8x128xf32, #tpu.memory_space<vmem>>) attributes {dimension_semantics = [#tpu.dimension_semantics<parallel>, #tpu.dimension_semantics<parallel>, #tpu.dimension_semantics<parallel>], iteration_bounds = array<i64: 2, 8, 4>, scalar_prefetch = 1 : i64, scratch_operands = 0 : i64, tpu.core_type = #tpu.core_type<tc>, window_params = [{transform_indices = @transform_0, window_bounds = array<i64: 1, 5, 16, 20>}, {transform_indices = @transform_1, window_bounds = array<i64: 1, 80, 128>}, {transform_indices = @transform_2, window_bounds = array<i64: 1, 1, 1, 8, 128>}]} {
    %c8_i32 = arith.constant 8 : i32
    %0 = arith.muli %arg1, %c8_i32 : i32
    %c0_i32 = arith.constant 0 : i32
    %1 = arith.addi %0, %c0_i32 : i32
    %2 = arith.index_cast %1 : i32 to index
    %3 = memref.load %arg3[%2] : memref<64xi32, #tpu.memory_space<smem>>
    %c0_i32_0 = arith.constant 0 : i32
    %4 = arith.addi %0, %c0_i32_0 : i32
    %c1_i32 = arith.constant 1 : i32
    %5 = arith.addi %4, %c1_i32 : i32
    %6 = arith.index_cast %5 : i32 to index
    %7 = memref.load %arg3[%6] : memref<64xi32, #tpu.memory_space<smem>>
    %8 = arith.addi %arg2, %3 : i32
    %c0 = arith.constant 0 : index
    %9 = arith.index_cast %8 : i32 to index
    %10 = arith.index_cast %7 : i32 to index
    %c0_1 = arith.constant 0 : index
    %11 = vector.load %arg4[%c0, %9, %10, %c0_1] : memref<1x5x16x20xf32, #tpu.memory_space<vmem>>, vector<1x1x8x20xf32>
    %12 = vector.shape_cast %11 : vector<1x1x8x20xf32> to vector<1x8x20xf32>
    %13 = vector.shape_cast %12 : vector<1x8x20xf32> to vector<8x20xf32>
    %c2_i32 = arith.constant 2 : i32
    %14 = arith.addi %0, %c2_i32 : i32
    %15 = arith.index_cast %14 : i32 to index
    %16 = memref.load %arg3[%15] : memref<64xi32, #tpu.memory_space<smem>>
    %c2_i32_2 = arith.constant 2 : i32
    %17 = arith.addi %0, %c2_i32_2 : i32
    %c1_i32_3 = arith.constant 1 : i32
    %18 = arith.addi %17, %c1_i32_3 : i32
    %19 = arith.index_cast %18 : i32 to index
    %20 = memref.load %arg3[%19] : memref<64xi32, #tpu.memory_space<smem>>
    %21 = arith.addi %arg2, %16 : i32
    %c0_4 = arith.constant 0 : index
    %22 = arith.index_cast %21 : i32 to index
    %23 = arith.index_cast %20 : i32 to index
    %c0_5 = arith.constant 0 : index
    %24 = vector.load %arg4[%c0_4, %22, %23, %c0_5] : memref<1x5x16x20xf32, #tpu.memory_space<vmem>>, vector<1x1x8x20xf32>
    %25 = vector.shape_cast %24 : vector<1x1x8x20xf32> to vector<1x8x20xf32>
    %26 = vector.shape_cast %25 : vector<1x8x20xf32> to vector<8x20xf32>
    %c4_i32 = arith.constant 4 : i32
    %27 = arith.addi %0, %c4_i32 : i32
    %28 = arith.index_cast %27 : i32 to index
    %29 = memref.load %arg3[%28] : memref<64xi32, #tpu.memory_space<smem>>
    %c4_i32_6 = arith.constant 4 : i32
    %30 = arith.addi %0, %c4_i32_6 : i32
    %c1_i32_7 = arith.constant 1 : i32
    %31 = arith.addi %30, %c1_i32_7 : i32
    %32 = arith.index_cast %31 : i32 to index
    %33 = memref.load %arg3[%32] : memref<64xi32, #tpu.memory_space<smem>>
    %34 = arith.addi %arg2, %29 : i32
    %c0_8 = arith.constant 0 : index
    %35 = arith.index_cast %34 : i32 to index
    %36 = arith.index_cast %33 : i32 to index
    %c0_9 = arith.constant 0 : index
    %37 = vector.load %arg4[%c0_8, %35, %36, %c0_9] : memref<1x5x16x20xf32, #tpu.memory_space<vmem>>, vector<1x1x8x20xf32>
    %38 = vector.shape_cast %37 : vector<1x1x8x20xf32> to vector<1x8x20xf32>
    %39 = vector.shape_cast %38 : vector<1x8x20xf32> to vector<8x20xf32>
    %c6_i32 = arith.constant 6 : i32
    %40 = arith.addi %0, %c6_i32 : i32
    %41 = arith.index_cast %40 : i32 to index
    %42 = memref.load %arg3[%41] : memref<64xi32, #tpu.memory_space<smem>>
    %c6_i32_10 = arith.constant 6 : i32
    %43 = arith.addi %0, %c6_i32_10 : i32
    %c1_i32_11 = arith.constant 1 : i32
    %44 = arith.addi %43, %c1_i32_11 : i32
    %45 = arith.index_cast %44 : i32 to index
    %46 = memref.load %arg3[%45] : memref<64xi32, #tpu.memory_space<smem>>
    %47 = arith.addi %arg2, %42 : i32
    %c0_12 = arith.constant 0 : index
    %48 = arith.index_cast %47 : i32 to index
    %49 = arith.index_cast %46 : i32 to index
    %c0_13 = arith.constant 0 : index
    %50 = vector.load %arg4[%c0_12, %48, %49, %c0_13] : memref<1x5x16x20xf32, #tpu.memory_space<vmem>>, vector<1x1x8x20xf32>
    %51 = vector.shape_cast %50 : vector<1x1x8x20xf32> to vector<1x8x20xf32>
    %52 = vector.shape_cast %51 : vector<1x8x20xf32> to vector<8x20xf32>
    %53 = tpu.concatenate %13, %26, %39, %52 in 1 : vector<8x20xf32>, vector<8x20xf32>, vector<8x20xf32>, vector<8x20xf32> -> vector<8x80xf32>
    %c0_14 = arith.constant 0 : index
    %c0_15 = arith.constant 0 : index
    %c0_16 = arith.constant 0 : index
    %54 = vector.load %arg5[%c0_14, %c0_15, %c0_16] : memref<1x80x128xf32, #tpu.memory_space<vmem>>, vector<1x80x128xf32>
    %55 = vector.shape_cast %54 : vector<1x80x128xf32> to vector<80x128xf32>
    %cst = arith.constant dense<0.000000e+00> : vector<8x128xf32>
    %56 = tpu.matmul %53, %55, %cst {dimension_numbers = #tpu.dot_dimension_numbers<[1], [0], [0], [1], [0, 0, 1, 1], [], []>} : vector<8x80xf32>, vector<80x128xf32>, vector<8x128xf32> -> vector<8x128xf32>
    %c0_17 = arith.constant 0 : index
    %c0_18 = arith.constant 0 : index
    %c0_19 = arith.constant 0 : index
    %c0_20 = arith.constant 0 : index
    %c0_21 = arith.constant 0 : index
    %57 = vector.load %arg6[%c0_17, %c0_18, %c0_19, %c0_20, %c0_21] : memref<1x1x1x8x128xf32, #tpu.memory_space<vmem>>, vector<1x1x1x8x128xf32>
    %58 = vector.shape_cast %57 : vector<1x1x1x8x128xf32> to vector<8x128xf32>
    %59 = vector.shape_cast %56 : vector<8x128xf32> to vector<1x1x1x8x128xf32>
    tpu.vector_store %arg6[%c0_17, %c0_18, %c0_19, %c0_20, %c0_21], %59 {strides = array<i32>} : memref<1x1x1x8x128xf32, #tpu.memory_space<vmem>>, vector<1x1x1x8x128xf32>,
    return
  }
  func.func @transform_0(%arg0: i32, %arg1: i32, %arg2: i32, %arg3: memref<64xi32, #tpu.memory_space<smem>>) -> (i32, i32, i32, i32) {
    %c0_i32 = arith.constant 0 : i32
    %c0_i32_0 = arith.constant 0 : i32
    %c0_i32_1 = arith.constant 0 : i32
    %c0_i32_2 = arith.constant 0 : i32
    return %arg0, %c0_i32, %c0_i32_0, %c0_i32_1 : i32, i32, i32, i32
  }
  func.func @transform_1(%arg0: i32, %arg1: i32, %arg2: i32, %arg3: memref<64xi32, #tpu.memory_space<smem>>) -> (i32, i32, i32) {
    %c0_i32 = arith.constant 0 : i32
    %c0_i32_0 = arith.constant 0 : i32
    %c0_i32_1 = arith.constant 0 : i32
    return %arg1, %c0_i32, %c0_i32_0 : i32, i32, i32
  }
  func.func @transform_2(%arg0: i32, %arg1: i32, %arg2: i32, %arg3: memref<64xi32, #tpu.memory_space<smem>>) -> (i32, i32, i32, i32, i32) {
    %c0_i32 = arith.constant 0 : i32
    %c0_i32_0 = arith.constant 0 : i32
    %c0_i32_1 = arith.constant 0 : i32
    return %arg0, %arg1, %arg2, %c0_i32, %c0_i32_0 : i32, i32, i32, i32, i32
  }
}

module attributes {stable_mosaic.version = 11 : i64} {
  func.func @_deconv_kernel(%arg0: i32, %arg1: i32, %arg2: i32, %arg3: memref<64xi32, #tpu.memory_space<smem>>, %arg4: memref<1x8x16x64xf32, #tpu.memory_space<vmem>>, %arg5: memref<1x256x128xf32, #tpu.memory_space<vmem>>, %arg6: memref<1x1x1x8x128xf32, #tpu.memory_space<vmem>>) attributes {dimension_semantics = [#tpu.dimension_semantics<parallel>, #tpu.dimension_semantics<parallel>, #tpu.dimension_semantics<parallel>], iteration_bounds = array<i64: 2, 8, 7>, scalar_prefetch = 1 : i64, scratch_operands = 0 : i64, tpu.core_type = #tpu.core_type<tc>, window_params = [{transform_indices = @transform_0, window_bounds = array<i64: 1, 8, 16, 64>}, {transform_indices = @transform_1, window_bounds = array<i64: 1, 256, 128>}, {transform_indices = @transform_2, window_bounds = array<i64: 1, 1, 1, 8, 128>}]} {
    %c8_i32 = arith.constant 8 : i32
    %0 = arith.muli %arg1, %c8_i32 : i32
    %c0_i32 = arith.constant 0 : i32
    %1 = arith.addi %0, %c0_i32 : i32
    %2 = arith.index_cast %1 : i32 to index
    %3 = memref.load %arg3[%2] : memref<64xi32, #tpu.memory_space<smem>>
    %c0_i32_0 = arith.constant 0 : i32
    %4 = arith.addi %0, %c0_i32_0 : i32
    %c1_i32 = arith.constant 1 : i32
    %5 = arith.addi %4, %c1_i32 : i32
    %6 = arith.index_cast %5 : i32 to index
    %7 = memref.load %arg3[%6] : memref<64xi32, #tpu.memory_space<smem>>
    %8 = arith.addi %arg2, %3 : i32
    %c0 = arith.constant 0 : index
    %9 = arith.index_cast %8 : i32 to index
    %10 = arith.index_cast %7 : i32 to index
    %c0_1 = arith.constant 0 : index
    %11 = vector.load %arg4[%c0, %9, %10, %c0_1] : memref<1x8x16x64xf32, #tpu.memory_space<vmem>>, vector<1x1x8x64xf32>
    %12 = vector.shape_cast %11 : vector<1x1x8x64xf32> to vector<1x8x64xf32>
    %13 = vector.shape_cast %12 : vector<1x8x64xf32> to vector<8x64xf32>
    %c2_i32 = arith.constant 2 : i32
    %14 = arith.addi %0, %c2_i32 : i32
    %15 = arith.index_cast %14 : i32 to index
    %16 = memref.load %arg3[%15] : memref<64xi32, #tpu.memory_space<smem>>
    %c2_i32_2 = arith.constant 2 : i32
    %17 = arith.addi %0, %c2_i32_2 : i32
    %c1_i32_3 = arith.constant 1 : i32
    %18 = arith.addi %17, %c1_i32_3 : i32
    %19 = arith.index_cast %18 : i32 to index
    %20 = memref.load %arg3[%19] : memref<64xi32, #tpu.memory_space<smem>>
    %21 = arith.addi %arg2, %16 : i32
    %c0_4 = arith.constant 0 : index
    %22 = arith.index_cast %21 : i32 to index
    %23 = arith.index_cast %20 : i32 to index
    %c0_5 = arith.constant 0 : index
    %24 = vector.load %arg4[%c0_4, %22, %23, %c0_5] : memref<1x8x16x64xf32, #tpu.memory_space<vmem>>, vector<1x1x8x64xf32>
    %25 = vector.shape_cast %24 : vector<1x1x8x64xf32> to vector<1x8x64xf32>
    %26 = vector.shape_cast %25 : vector<1x8x64xf32> to vector<8x64xf32>
    %c4_i32 = arith.constant 4 : i32
    %27 = arith.addi %0, %c4_i32 : i32
    %28 = arith.index_cast %27 : i32 to index
    %29 = memref.load %arg3[%28] : memref<64xi32, #tpu.memory_space<smem>>
    %c4_i32_6 = arith.constant 4 : i32
    %30 = arith.addi %0, %c4_i32_6 : i32
    %c1_i32_7 = arith.constant 1 : i32
    %31 = arith.addi %30, %c1_i32_7 : i32
    %32 = arith.index_cast %31 : i32 to index
    %33 = memref.load %arg3[%32] : memref<64xi32, #tpu.memory_space<smem>>
    %34 = arith.addi %arg2, %29 : i32
    %c0_8 = arith.constant 0 : index
    %35 = arith.index_cast %34 : i32 to index
    %36 = arith.index_cast %33 : i32 to index
    %c0_9 = arith.constant 0 : index
    %37 = vector.load %arg4[%c0_8, %35, %36, %c0_9] : memref<1x8x16x64xf32, #tpu.memory_space<vmem>>, vector<1x1x8x64xf32>
    %38 = vector.shape_cast %37 : vector<1x1x8x64xf32> to vector<1x8x64xf32>
    %39 = vector.shape_cast %38 : vector<1x8x64xf32> to vector<8x64xf32>
    %c6_i32 = arith.constant 6 : i32
    %40 = arith.addi %0, %c6_i32 : i32
    %41 = arith.index_cast %40 : i32 to index
    %42 = memref.load %arg3[%41] : memref<64xi32, #tpu.memory_space<smem>>
    %c6_i32_10 = arith.constant 6 : i32
    %43 = arith.addi %0, %c6_i32_10 : i32
    %c1_i32_11 = arith.constant 1 : i32
    %44 = arith.addi %43, %c1_i32_11 : i32
    %45 = arith.index_cast %44 : i32 to index
    %46 = memref.load %arg3[%45] : memref<64xi32, #tpu.memory_space<smem>>
    %47 = arith.addi %arg2, %42 : i32
    %c0_12 = arith.constant 0 : index
    %48 = arith.index_cast %47 : i32 to index
    %49 = arith.index_cast %46 : i32 to index
    %c0_13 = arith.constant 0 : index
    %50 = vector.load %arg4[%c0_12, %48, %49, %c0_13] : memref<1x8x16x64xf32, #tpu.memory_space<vmem>>, vector<1x1x8x64xf32>
    %51 = vector.shape_cast %50 : vector<1x1x8x64xf32> to vector<1x8x64xf32>
    %52 = vector.shape_cast %51 : vector<1x8x64xf32> to vector<8x64xf32>
    %53 = tpu.concatenate %13, %26, %39, %52 in 1 : vector<8x64xf32>, vector<8x64xf32>, vector<8x64xf32>, vector<8x64xf32> -> vector<8x256xf32>
    %c0_14 = arith.constant 0 : index
    %c0_15 = arith.constant 0 : index
    %c0_16 = arith.constant 0 : index
    %54 = vector.load %arg5[%c0_14, %c0_15, %c0_16] : memref<1x256x128xf32, #tpu.memory_space<vmem>>, vector<1x256x128xf32>
    %55 = vector.shape_cast %54 : vector<1x256x128xf32> to vector<256x128xf32>
    %cst = arith.constant dense<0.000000e+00> : vector<8x128xf32>
    %56 = tpu.matmul %53, %55, %cst {dimension_numbers = #tpu.dot_dimension_numbers<[1], [0], [0], [1], [0, 0, 1, 1], [], []>} : vector<8x256xf32>, vector<256x128xf32>, vector<8x128xf32> -> vector<8x128xf32>
    %c0_17 = arith.constant 0 : index
    %c0_18 = arith.constant 0 : index
    %c0_19 = arith.constant 0 : index
    %c0_20 = arith.constant 0 : index
    %c0_21 = arith.constant 0 : index
    %57 = vector.load %arg6[%c0_17, %c0_18, %c0_19, %c0_20, %c0_21] : memref<1x1x1x8x128xf32, #tpu.memory_space<vmem>>, vector<1x1x1x8x128xf32>
    %58 = vector.shape_cast %57 : vector<1x1x1x8x128xf32> to vector<8x128xf32>
    %59 = vector.shape_cast %56 : vector<8x128xf32> to vector<1x1x1x8x128xf32>
    tpu.vector_store %arg6[%c0_17, %c0_18, %c0_19, %c0_20, %c0_21], %59 {strides = array<i32>} : memref<1x1x1x8x128xf32, #tpu.memory_space<vmem>>, vector<1x1x1x8x128xf32>,
    return
  }
  func.func @transform_0(%arg0: i32, %arg1: i32, %arg2: i32, %arg3: memref<64xi32, #tpu.memory_space<smem>>) -> (i32, i32, i32, i32) {
    %c0_i32 = arith.constant 0 : i32
    %c0_i32_0 = arith.constant 0 : i32
    %c0_i32_1 = arith.constant 0 : i32
    %c0_i32_2 = arith.constant 0 : i32
    return %arg0, %c0_i32, %c0_i32_0, %c0_i32_1 : i32, i32, i32, i32
  }
  func.func @transform_1(%arg0: i32, %arg1: i32, %arg2: i32, %arg3: memref<64xi32, #tpu.memory_space<smem>>) -> (i32, i32, i32) {
    %c0_i32 = arith.constant 0 : i32
    %c0_i32_0 = arith.constant 0 : i32
    %c0_i32_1 = arith.constant 0 : i32
    return %arg1, %c0_i32, %c0_i32_0 : i32, i32, i32
  }
  func.func @transform_2(%arg0: i32, %arg1: i32, %arg2: i32, %arg3: memref<64xi32, #tpu.memory_space<smem>>) -> (i32, i32, i32, i32, i32) {
    %c0_i32 = arith.constant 0 : i32
    %c0_i32_0 = arith.constant 0 : i32
    %c0_i32_1 = arith.constant 0 : i32
    return %arg0, %arg1, %arg2, %c0_i32, %c0_i32_0 : i32, i32, i32, i32, i32
  }
}

</mosaic_0001>

<bundles_post_ra>
// kernel: _forward_impl.2
= control target key start
LH: loop header
LB: loop body
LE: loop exit
PB: predicated region body
PF: predicated region fallthrough
CT: control target
= control target key end

     0   :  { %s780_s12 = smov [#allocation3]   ;;  %s1009_s0 = inlined_call_operand.hbm [shape: s32[64], index: 0, kind: input, shape index: {}]   ;;  %s1010_s1 = inlined_call_operand.vmem [shape: f32[2,5,16,20], index: 1, kind: input, shape index: {}]   ;;  %s1011_s2 = inlined_call_operand.hbm [shape: f32[8,80,128], index: 2, kind: input, shape index: {}]   ;;  %s1012_s3 = inlined_call_operand.vmem [shape: f32[2,8,4,8,128], index: 3, kind: output, shape index: {}]  }
   0x1   :  { %1013 = sst [smem:[#allocation8_spill]] %s1010_s1 }
   0x2   :  { %1014 = sst [smem:[#allocation9_spill]] %s1011_s2 }
   0x3   :  { %9 = dma.hbm_to_smem %s1009_s0, 16, %s780_s12, [#allocation2] }
   0x4   :  { %734 = dma.done.wait [#allocation2], 16 }
   0x5   :  { %735 = vsyncadd [#allocation2], 4294967280 }
   0x6   :  { %11 = sfence }
   0x7   :  { %12 = vsyncpa [#allocation5], 0 }
   0x8   :  { %14 = vsyncpa [#allocation5 + $0x1], 0  ;;  %s812_s15 = smov 0   ;;  %s814_s16 = smov 0  }
   0x9   :  { %s816_s17 = smov 0   ;;  %s818_s18 = smov 0  }
   0xa   :  { %s820_s19 = smov 0   ;;  %s822_s20 = smov 0  }
   0xb   :  { %s824_s21 = smov 0   ;;  %s826_s0 = smov 0  }
   0xc   :  { %s828_s22 = smov 0   ;;  %s830_s23 = smov 0  }
   0xd LB: > { %s507_s24 = sadd.s32 4294967295, %s778_s23   ;;  %s32_s25 = sadd.s32 1, %s766_s21  ;;  %s778_s23 = sphi %s830_s23, %s20_s23   ;;  %s774_s22 = sphi %s828_s22, %s1028_s22   ;;  %s770_s0 = sphi %s826_s0, %s1027_s0   ;;  %s766_s21 = sphi %s824_s21, %s1026_s21   ;;  %s762_s20 = sphi %s822_s20, %s1025_s20   ;;  %s758_s19 = sphi %s820_s19, %s1024_s19   ;;  %s754_s18 = sphi %s818_s18, %s1023_s18   ;;  %s750_s17 = sphi %s816_s17, %s1022_s17   ;;  %s746_s16 = sphi %s814_s16, %s1021_s16   ;;  %s742_s15 = sphi %s812_s15, %s1020_s15  }
   0xe   : > { %p33_p0 = scmp.ge.s32.totalorder %s32_s25, 4  ;;  %s35_s26 = sadd.s32 1, %s770_s0 }
   0xf   : > { %s39_s27 = sadd.s32 1, %s774_s22  ;;  %s72_s28 = sadd.s32 1, %s750_s17 }
  0x10   : > { %s1030_s25 = smov (%p33_p0, %s32_s25), 0  ;;  %s1032_s26 = smov (!%p33_p0, %s35_s26), %s770_s0 }
  0x11   : > { %p79_p1 = scmp.ne.s32.totalorder %s750_s17, %s746_s16  ;;  %p80_p2 = scmp.eq.s32.totalorder %s778_s23, 0 }
  0x12   : > { %p37_p3 = scmp.ge.s32.totalorder %s1032_s26, 8  ;;  %p85_p4 = scmp.ne.s32.totalorder %s746_s16, %s742_s15 }
  0x13   : > { %p872_p5 = por %p80_p2, %p79_p1  ;;  %p86_p6 = scmp.eq.s32.totalorder %s507_s24, 0 }
  0x14   : > { %s1034_s26 = smov (%p37_p3, %s1032_s26), 0  ;;  %s1036_s27 = smov (!%p37_p3, %s39_s27), %s774_s22 }
  0x15   : > { %s69_s30 = ssub.s32 %s770_s0, %s1034_s26  ;;  %p881_p7 = por %p86_p6, %p85_p4 }
  0x16   : > { %p41_p8 = scmp.ge.s32.totalorder %s1036_s27, 2  ;;  %p70_p9 = scmp.eq.s32.totalorder %s69_s30, 0 }
  0x17   : > { %p569_p10 = scmp.lt.s32.totalorder %s778_s23, 64  ;;  %s147_s6 = sand.u32 1, %s750_s17  }
  0x18   : > { %s1038_s27 = smov (%p41_p8, %s1036_s27), 0  ;;  %s560_s7 = smul.u32 1280, %s770_s0 }
  0x19   : > { %s889_s5 = scalar_select %p70_p9, %s750_s17, %s72_s28  }
  0x1a   : > { %s559_s8 = smul.u32 80, %s147_s6  ;;  %s1017_s2 = sld [smem:[#allocation9_spill]] }
  0x1b   : > { %p898_p11 = pnand %p569_p10, %p872_p5  ;;  %s148_s15 = scalar_lea.sflag [#allocation5], %s147_s6 }
  0x1c   : > { %s151_s13 = scalar_lea.vmem [#allocation4], %s559_s8  ;;  %s781_s28 = smov [#allocation4]  }
  0x1d   : > { %s158_s14 = sshll.u32 %s151_s13, 4  ;;  %p668_p12 = pneg %p898_p11  ;;  %s159_s14 = int_to_ptr.vmem [resolvable:$true] %s158_s14 }
  0x1e   : > { %s679_s24 = scalar_lea.vmem %s159_s14, 1280  ;;  %s684_s30 = sshll.u32 %s781_s28, 4  ;;  %s685_s30 = int_to_ptr.vmem [resolvable:$false] %s684_s30 }
  0x1f   : > { %p680_p13 = scmp.ne.s32.totalorder %s159_s14, %s679_s24  ;;  %p687_p2 = scmp.lt.s32.totalorder %s159_s14, %s685_s30 }
  0x20   : > { %s157_s11 = scalar_lea.hbm %s1017_s2, %s560_s7  ;;  %s686_s7 = scalar_lea.vmem %s685_s30, 2560 }
  0x21   : > { %p682_p0 = pnand %p680_p13, %p668_p12  ;;  %p688_p3 = scmp.lt.s32.totalorder %s686_s7, %s679_s24 }
  0x23   : > { %p683_p1 = pneg %p682_p0  ;;  %p689_p4 = por %p688_p3, %p687_p2 }
  0x25   : > { %p690_p5 = pnand %p689_p4, %p683_p1 }
  0x27   : > { %693 = shalt.err (!%p690_p5)
}
  0x28   : > { %s782_s29 = smov 128   ;;  %s783_s6 = smov 8  }
  0x29   : > { %568 = dma.hbm_to_vmem [thread:$0]  (!%p898_p11), %s157_s11, 1280, %s159_s14, %s148_s15, %s782_s29, %s782_s29, %s783_s6  }
  0x2a   : > { %p512_p6 = scmp.ge.s32.totalorder %s778_s23, 1  ;;  %p166_p8 = scmp.lt.s32.totalorder %s778_s23, 65 }
  0x2c   : > { %p167_p9 = pnand %p512_p6, %p166_p8 }
  0x2d   : > { %s172_s8 = sand.u32 (!%p167_p9), 1, %s746_s16  }
  0x2e   : > { %170 = sbr.rel (%p167_p9) target bundleno = 384 (0x180), region = 28  ;;  %s173_s10 = scalar_lea.sflag (!%p167_p9), [#allocation5], %s172_s8 }
  0x2f   : > { %s561_s9 = smul.u32 (!%p167_p9), 80, %s172_s8 }
  0x31   : > { %s909_s13 = scalar_lea.vmem (!%p167_p9), [#allocation4], %s561_s9 }
  0x33   : > { %737 = dma.done.wait (%p881_p7), %s173_s10, 1280  }
  0x34   : > { %739 = vsyncadd (%p881_p7), %s173_s10, 4294966016  ;;  %p209_p10 = scmp.lt.s32.totalorder %s762_s20, 1  ;;  %s917_s11 = sshll.u32 %s758_s19, 3  ;;  %v784_v0 = vmov 0.0   ;;  %v289_v1 = vld [vmem:[%s909_s13 + $0x48] sm:$0xff]  ;;  %v288_v2 = vld [vmem:[%s909_s13 + $0x40] sm:$0xff] }
  0x35   : > { %s235_s12 = sadd.s32 2, %s917_s11  ;;  %s237_s14 = sadd.s32 3, %s917_s11  ;;  %536 = vmatprep.subr.mxu0 %v784_v0  ;;  %vm785_vm0 = vmmov 0   ;;  %v287_v3 = vld [vmem:[%s909_s13 + $0x38] sm:$0xff]  ;;  %v286_v4 = vld [vmem:[%s909_s13 + $0x30] sm:$0xff]  ;;  %v285_v6 = vld [vmem:[%s909_s13 + $0x28] sm:$0xff] }
  0x36   : > { %s1040_s20 = smov (!%p209_p10, %s762_s20), 1  ;;  %s236_s4 = sld [smem:[#allocation3 + %s235_s12]]  ;;  %556 = vmatprep.mubr.msk.f32.mxu0 %vm785_vm0, %v784_v0  ;;  %537 = vmatpush3.msra.mxu0 %v289_v1  ;;  %v284_v7 = vld [vmem:[%s909_s13 + $0x20] sm:$0xff]  ;;  %v283_v9 = vld [vmem:[%s909_s13 + $0x18] sm:$0xff]  ;;  %v282_v11 = vld [vmem:[%s909_s13 + $0x10] sm:$0xff]  ;;  %vm274_vm1 = vcmask 162816  }
  0x37   : > { %s562_s15 = smul.u32 80, %s1040_s20  ;;  %s238_s24 = sld [smem:[#allocation3 + %s237_s14]]  ;;  %538 = vmatprep.subr.mxu0 %v784_v0  ;;  %v281_v12 = vld [vmem:[%s909_s13 + $0x8] sm:$0xff]  ;;  %v280_v13 = vld [vmem:[%s909_s13] sm:$0xff]  ;;  %vm276_vm2 = vcmask 326656   ;;  %vm278_vm3 = vcmask 490496  }
  0x38   : > { %s244_s28 = sadd.s32 4, %s917_s11  ;;  %s246_s30 = sadd.s32 5, %s917_s11  ;;  %539 = vmatpush3.msra.mxu0 %v288_v2  ;;  %vm290_vm4 = vcmask 654336  }
  0x39   : > { %s245_s7 = sld [smem:[#allocation3 + %s244_s28]]  ;;  %s253_s10 = sadd.s32 6, %s917_s11  ;;  %540 = vmatprep.subr.mxu0 %v784_v0 }
  0x3a   : > { %s1019_s1 = sld [smem:[#allocation8_spill]]  ;;  %s255_s12 = sadd.s32 7, %s917_s11  ;;  %541 = vmatpush3.msra.mxu0 %v287_v3 }
  0x3b   : > { %s933_s9 = sld [smem:[#allocation3 + %s246_s30]]  ;;  %542 = vmatprep.subr.mxu0 %v784_v0  ;;  %p216_p7 = scmp.lt.s32.totalorder %s758_s19, 7 }
  0x3c   : > { %s239_s14 = sadd.s32 %s754_s18, %s236_s4  ;;  %s254_s28 = sld [smem:[#allocation3 + %s253_s10]]  ;;  %543 = vmatpush3.msra.mxu0 %v286_v4 }
  0x3d   : > { %s943_s30 = sld [smem:[#allocation3 + %s255_s12]]  ;;  %s228_s12 = sadd.s32 1, %s917_s11  ;;  %544 = vmatprep.subr.mxu0 %v784_v0 }
  0x3e   : > { %545 = vmatpush3.msra.mxu0 %v285_v6  ;;  %p218_p11 = scmp.lt.s32.totalorder %s754_s18, 3  ;;  %s1042_s19 = smov (!%p216_p7, %s758_s19), 7 }
  0x3f   : > { %s248_s4 = sadd.s32 %s754_s18, %s245_s7  ;;  %546 = vmatprep.subr.mxu0 %v784_v0  ;;  %s514_s13 = sshll.u32 %s1042_s19, 2 }
  0x40   : > { %s931_s8 = scalar_lea.vmem %s1019_s1, %s562_s15  ;;  %s519_s15 = sshll.u32 %s239_s14, 4  ;;  %547 = vmatpush3.msra.mxu0 %v284_v7 }
  0x41   : > { %s241_s29 = sadd.s32 %s519_s15, %s238_s24  ;;  %s520_s10 = sshll.u32 %s248_s4, 4  ;;  %548 = vmatprep.subr.mxu0 %v784_v0 }
  0x42   : > { %s242_s6 = scalar_lea.vmem %s931_s8, %s241_s29  ;;  %s786_s14 = smov 20   ;;  %549 = vmatpush3.msra.mxu0 %v283_v9 }
  0x43   : > { %v243_v5 = vld [vmem:[%s242_s6] sm:$0xff]  ;;  %s250_s24 = sadd.s32 %s520_s10, %s933_s9  ;;  %s227_s15 = sld [smem:[#allocation3 + %s917_s11]]  ;;  %550 = vmatprep.subr.mxu0 %v784_v0 }
  0x44   : > { %263 = vrot.lane.b32.xlu0 %v243_v5, %s786_s14  ;;  %s251_s1 = scalar_lea.vmem %s931_s8, %s250_s24  ;;  %s257_s2 = sadd.s32 %s754_s18, %s254_s28  ;;  %551 = vmatpush3.msra.mxu0 %v282_v11 }
  0x45   : > { %v252_v8 = vld [vmem:[%s251_s1] sm:$0xff]  ;;  %s521_s7 = sshll.u32 %s257_s2, 4  ;;  %s229_s29 = sld [smem:[#allocation3 + %s228_s12]]  ;;  %552 = vmatprep.subr.mxu0 %v784_v0 }
  0x46   : > { %s259_s6 = sadd.s32 %s521_s7, %s943_s30  ;;  %s787_s9 = smov 40   ;;  %553 = vmatpush3.msra.mxu0 %v281_v12 }
  0x47   : > { %s260_s11 = scalar_lea.vmem %s931_s8, %s259_s6  ;;  %s788_s1 = smov 60   ;;  %554 = vmatprep.subr.mxu0 %v784_v0 }
  0x48   : > { %267 = vrot.lane.b32.xlu0 %v252_v8, %s787_s9  ;;  %v261_v10 = vld [vmem:[%s260_s11] sm:$0xff]  ;;  %555 = vmatpush3.msra.mxu0 %v280_v13  ;;  %s515_s10 = sshll.u32 %s1040_s20, 5 }
  0x49   : > { %271 = vrot.lane.b32.xlu1 %v261_v10, %s788_s1  ;;  %s230_s2 = sadd.s32 %s754_s18, %s227_s15  ;;  %s1044_s18 = smov (!%p218_p11, %s754_s18), 3 }
  0x4a   : > { %s518_s28 = sshll.u32 %s230_s2, 4 }
  0x4b   : > { %s232_s30 = sadd.s32 %s518_s28, %s229_s29 }
  0x4c   : > { %s233_s4 = scalar_lea.vmem %s931_s8, %s232_s30  ;;  %s221_s8 = sadd.s32 %s514_s13, %s1044_s18 }
  0x4d   : > { %v234_v15 = vld [vmem:[%s233_s4] sm:$0xff]  ;;  %s223_s12 = sadd.s32 %s515_s10, %s221_s8 }
  0x4e   : > { %s516_s14 = sshll.u32 %s223_s12, 3 }
  0x4f   : > { %s225_s7 = scalar_lea.vmem %s1012_s3, %s516_s14 }
  0xb6   : > { %v264_v14 = vpop.permute.xlu0 %263 }
  0xb7   : > { %v275_v16 = vsel %vm274_vm1, %v234_v15, %v264_v14 }
  0xba   : > { %v268_v17 = vpop.permute.xlu0 %267 }
  0xbb   : > { %v277_v18 = vsel %vm276_vm2, %v275_v16, %v268_v17  ;;  %v272_v19 = vpop.permute.xlu1 %271 }
  0xbc   : > { %v279_v20 = vsel %vm278_vm3, %v277_v18, %v272_v19 }
  0xbd   : > { %557 = vmatmul.mubr.msk.f32.vlgmr.msra.gmra.mxu0 %vm290_vm4, %v279_v20 }
 0x17d   : > { %v360_v21 = vpop.f32.mrf.mxu0 }
 0x17e   : > { %364 = vst [vmem:[%s225_s7] sm:$0xff] %v360_v21 }
 0x17f   : > { %v558_v22 = vpop.f32.mrf.mxu0 }
 0x180 PF: > { %s20_s23 = sadd.s32 1, %s778_s23   ;;  %s1020_s15 = smov %s746_s16 }
 0x181   : > { %p17_p12 = scmp.ge.s32.totalorder %s20_s23, 66   ;;  %s1021_s16 = smov %s750_s17 }
 0x182   : > { %s1022_s17 = smov %s889_s5  ;;  %s1023_s18 = smov %s766_s21 }
 0x183   : > { %s1024_s19 = smov %s770_s0  ;;  %s1025_s20 = smov %s774_s22 }
 0x184   : > { %s1026_s21 = smov %s1030_s25  ;;  %s1027_s0 = smov %s1034_s26 }
 0x185   : > { %s1028_s22 = smov %s1038_s27  ;;  %19 = sbr.rel (!%p17_p12) target bundleno = 13 (0xd), region = 75 }
 0x18a   :  { %400 = vsyncpa [#allocation5], 1 }
 0x18b   :  { %402 = vsyncpa [#allocation5 + $0x1], 1 }

// kernel: _forward_impl.3
= control target key start
LH: loop header
LB: loop body
LE: loop exit
PB: predicated region body
PF: predicated region fallthrough
CT: control target
= control target key end

     0   :  { %s853_s0 = inlined_call_operand.vmem [shape: s32[64], index: 0, kind: input, shape index: {}]   ;;  %s854_s1 = inlined_call_operand.vmem [shape: f32[2,8,16,64], index: 1, kind: input, shape index: {}]   ;;  %s855_s2 = inlined_call_operand.vmem [shape: f32[8,256,128], index: 2, kind: input, shape index: {}]   ;;  %s856_s3 = inlined_call_operand.vmem [shape: f32[2,8,7,8,128], index: 3, kind: output, shape index: {}]  }
   0x1   :  { %857 = sst [smem:[#allocation6_spill]] %s854_s1  ;;  %s8_s14 = sshll.u32 %s853_s0, 4  ;;  %s9_s14 = int_to_ptr.vmem [resolvable:$true] %s8_s14 }
   0x2   :  { %s607_s15 = scalar_lea.vmem %s9_s14, 16  ;;  %p612_p1 = scmp.lt.s32.totalorder %s9_s14, %s9_s14 }
   0x3   :  { %p608_p0 = scmp.ne.s32.totalorder %s9_s14, %s607_s15  ;;  %p613_p2 = scmp.lt.s32.totalorder %s607_s15, %s607_s15 }
   0x5   :  { %p614_p3 = por %p613_p2, %p612_p1 }
   0x7   :  { %p615_p4 = pnand %p614_p3, %p608_p0 }
   0x9   :  { %618 = shalt.err (!%p615_p4)  }
   0xa   :  { %s677_s16 = smov [#allocation3]  }
   0xb   :  { %11 = dma.vmem_to_smem %s9_s14, 16, %s677_s16, [#allocation2] }
   0xc   :  { %647 = dma.done.wait [#allocation2], 16 }
   0xd   :  { %648 = vsyncadd [#allocation2], 4294967280 }
   0xe   :  { %13 = sfence }
   0xf   :  { %s702_s17 = smov 0   ;;  %s704_s18 = smov 0  }
  0x10   :  { %s706_s19 = smov 0   ;;  %s708_s0 = smov 0  }
  0x11   :  { %s710_s20 = smov 0   ;;  %s712_s21 = smov 0  }
  0x12   :  { %s714_s22 = smov 0  }
  0x13 LB: > { %s31_s23 = sadd.s32 1, %s663_s0  ;;  %s34_s24 = sadd.s32 1, %s667_s20  ;;  %s675_s22 = sphi %s714_s22, %s19_s22   ;;  %s671_s21 = sphi %s712_s21, %s866_s21   ;;  %s667_s20 = sphi %s710_s20, %s865_s20   ;;  %s663_s0 = sphi %s708_s0, %s864_s0   ;;  %s659_s19 = sphi %s706_s19, %s863_s19   ;;  %s655_s18 = sphi %s704_s18, %s862_s18   ;;  %s651_s17 = sphi %s702_s17, %s861_s17  }
  0x14   : > { %p32_p5 = scmp.ge.s32.totalorder %s31_s23, 7  ;;  %p492_p6 = scmp.ge.s32.totalorder %s675_s22, 1 }
  0x15   : > { %p152_p7 = scmp.lt.s32.totalorder %s675_s22, 113  ;;  %s38_s25 = sadd.s32 1, %s671_s21 }
  0x16   : > { %s868_s23 = smov (%p32_p5, %s31_s23), 0  ;;  %s870_s24 = smov (!%p32_p5, %s34_s24), %s667_s20 }
  0x17   : > { %p153_p8 = pnand %p492_p6, %p152_p7  ;;  %p36_p9 = scmp.ge.s32.totalorder %s870_s24, 8 }
  0x18   : > { %p186_p11 = scmp.lt.s32.totalorder (!%p153_p8), %s659_s19, 1  ;;  %s749_s26 = sshll.u32 (!%p153_p8), %s655_s18, 3 }
  0x19   : > { %s872_s24 = smov (%p36_p9, %s870_s24), 0  ;;  %s874_s25 = smov (!%p36_p9, %s38_s25), %s671_s21 }
  0x1a   : > { %p40_p10 = scmp.ge.s32.totalorder %s874_s25, 2  ;;  %156 = sbr.rel (%p153_p8) target bundleno = 362 (0x16a), region = 28 }
  0x1b   : > { %s217_s27 = sadd.s32 (!%p153_p8), 2, %s749_s26  ;;  %s219_s28 = sadd.s32 (!%p153_p8), 3, %s749_s26 }
  0x1c   : > { %s876_s25 = smov (%p40_p10, %s874_s25), 0  ;;  %s218_s29 = sld [smem:[#allocation3 + %s217_s27]] (!%p153_p8) }
  0x1d   : > { %858 = sst [smem:[#allocation5_spill]] %s876_s25  ;;  %s235_s30 = sadd.s32 (!%p153_p8), 6, %s749_s26 }
  0x1e   : > { %s220_s5 = sld [smem:[#allocation3 + %s219_s28]] (!%p153_p8)  ;;  %s237_s10 = sadd.s32 (!%p153_p8), 7, %s749_s26 }
  0x1f   : > { %s878_s19 = smov (!%p186_p11, %s659_s19), 1  ;;  %s859_s1 = sld [smem:[#allocation6_spill]]  ;;  %vm252_vm0 = vcmask 523264  }
  0x20   : > { %s505_s4 = sshll.u32 %s878_s19, 7  ;;  %s236_s9 = sld [smem:[#allocation3 + %s235_s30]] }
  0x21   : > { %s238_s11 = sld [smem:[#allocation3 + %s237_s10]]  ;;  %p191_p12 = scmp.lt.s32.totalorder %s655_s18, 7 }
  0x22   : > { %s226_s12 = sadd.s32 4, %s749_s26  ;;  %s228_s13 = sadd.s32 5, %s749_s26 }
  0x23   : > { %s221_s14 = sadd.s32 %s651_s17, %s218_s29  ;;  %s227_s15 = sld [smem:[#allocation3 + %s226_s12]] }
  0x24   : > { %s500_s16 = sshll.u32 %s221_s14, 4  ;;  %s229_s27 = sld [smem:[#allocation3 + %s228_s13]] }
  0x25   : > { %s760_s8 = scalar_lea.vmem %s859_s1, %s505_s4  ;;  %s223_s28 = sadd.s32 %s500_s16, %s220_s5 }
  0x26   : > { %s239_s4 = sadd.s32 %s651_s17, %s236_s9  ;;  %s224_s6 = scalar_lea.vmem %s760_s8, %s223_s28 }
  0x27   : > { %s502_s7 = sshll.u32 %s239_s4, 4  ;;  %v225_v0 = vld [vmem:[%s224_s6] sm:$0xff]  ;;  %s209_s1 = sld [smem:[#allocation3 + %s749_s26]] }
  0x28   : > { %s241_s30 = sadd.s32 %s502_s7, %s238_s11  ;;  %s210_s10 = sadd.s32 1, %s749_s26 }
  0x29   : > { %s242_s25 = scalar_lea.vmem %s760_s8, %s241_s30  ;;  %s880_s18 = smov (!%p191_p12, %s655_s18), 7 }
  0x2a   : > { %v243_v1 = vld [vmem:[%s242_s25] sm:$0xff]  ;;  %s230_s29 = sadd.s32 %s651_s17, %s227_s15  ;;  %s211_s12 = sld [smem:[#allocation3 + %s210_s10]] }
  0x2b   : > { %v602_v2 = vpack.i.bf16 %v225_v0, %v243_v1  ;;  %s506_s13 = sshll.u32 %s880_s18, 8  ;;  %s501_s5 = sshll.u32 %s230_s29, 4 }
  0x2c   : > { %s678_s9 = smov 64   ;;  %s782_s11 = scalar_lea.vmem %s855_s2, %s506_s13 }
  0x2d   : > { %603 = vrot.lane.b32.xlu0 %v602_v2, %s678_s9  ;;  %s232_s25 = sadd.s32 %s501_s5, %s229_s27  ;;  %v286_v3 = vld [vmem:[%s782_s11 + $0xf8] sm:$0xff]  ;;  %v285_v5 = vld [vmem:[%s782_s11 + $0xf0] sm:$0xff]  ;;  %s212_s15 = sadd.s32 %s651_s17, %s209_s1  ;;  %v284_v7 = vld [vmem:[%s782_s11 + $0xe8] sm:$0xff] }
  0x2e   : > { %v270_v4 = vld [vmem:[%s782_s11 + $0x78] sm:$0xff]  ;;  %s788_s26 = scalar_lea.vmem %s760_s8, %s232_s25  ;;  %507 = vmatprep.subr.mxu0 %v286_v3  ;;  %v269_v6 = vld [vmem:[%s782_s11 + $0x70] sm:$0xff]  ;;  %s499_s28 = sshll.u32 %s212_s15, 4  ;;  %v268_v8 = vld [vmem:[%s782_s11 + $0x68] sm:$0xff] }
  0x2f   : > { %508 = vmatpush3.msra.mxu0 %v270_v4  ;;  %v283_v9 = vld [vmem:[%s782_s11 + $0xe0] sm:$0xff]  ;;  %v282_v11 = vld [vmem:[%s782_s11 + $0xd8] sm:$0xff]  ;;  %v281_v13 = vld [vmem:[%s782_s11 + $0xd0] sm:$0xff]  ;;  %p200_p13 = scmp.lt.s32.totalorder %s651_s17, 6  ;;  %s542_s1 = smul.u32 7, %s880_s18 }
  0x30   : > { %509 = vmatprep.subr.mxu0 %v285_v5  ;;  %s214_s27 = sadd.s32 %s499_s28, %s211_s12  ;;  %v267_v10 = vld [vmem:[%s782_s11 + $0x60] sm:$0xff]  ;;  %v266_v12 = vld [vmem:[%s782_s11 + $0x58] sm:$0xff]  ;;  %v265_v14 = vld [vmem:[%s782_s11 + $0x50] sm:$0xff] }
  0x31   : > { %510 = vmatpush3.msra.mxu0 %v269_v6  ;;  %s796_s4 = scalar_lea.vmem %s760_s8, %s214_s27  ;;  %v280_v15 = vld [vmem:[%s782_s11 + $0xc8] sm:$0xff]  ;;  %v279_v17 = vld [vmem:[%s782_s11 + $0xc0] sm:$0xff]  ;;  %v278_v19 = vld [vmem:[%s782_s11 + $0xb8] sm:$0xff]  ;;  %s882_s17 = smov (!%p200_p13, %s651_s17), 6 }
  0x32   : > { %511 = vmatprep.subr.mxu0 %v284_v7  ;;  %v264_v16 = vld [vmem:[%s782_s11 + $0x48] sm:$0xff]  ;;  %v263_v18 = vld [vmem:[%s782_s11 + $0x40] sm:$0xff]  ;;  %v262_v20 = vld [vmem:[%s782_s11 + $0x38] sm:$0xff]  ;;  %s543_s8 = smul.u32 56, %s878_s19  ;;  %s203_s6 = sadd.s32 %s542_s1, %s882_s17 }
  0x33   : > { %512 = vmatpush3.msra.mxu0 %v268_v8  ;;  %v277_v21 = vld [vmem:[%s782_s11 + $0xb0] sm:$0xff]  ;;  %v276_v23 = vld [vmem:[%s782_s11 + $0xa8] sm:$0xff]  ;;  %v275_v25 = vld [vmem:[%s782_s11 + $0xa0] sm:$0xff] }
  0x34   : > { %513 = vmatprep.subr.mxu0 %v283_v9  ;;  %v261_v22 = vld [vmem:[%s782_s11 + $0x30] sm:$0xff]  ;;  %v260_v24 = vld [vmem:[%s782_s11 + $0x28] sm:$0xff]  ;;  %v259_v26 = vld [vmem:[%s782_s11 + $0x20] sm:$0xff]  ;;  %s205_s7 = sadd.s32 %s543_s8, %s203_s6 }
  0x35   : > { %514 = vmatpush3.msra.mxu0 %v267_v10  ;;  %v274_v27 = vld [vmem:[%s782_s11 + $0x98] sm:$0xff]  ;;  %v273_v29 = vld [vmem:[%s782_s11 + $0x90] sm:$0xff]  ;;  %v272_v31 = vld [vmem:[%s782_s11 + $0x88] sm:$0xff]  ;;  %s497_s30 = sshll.u32 %s205_s7, 3 }
  0x36   : > { %515 = vmatprep.subr.mxu0 %v282_v11  ;;  %v258_v28 = vld [vmem:[%s782_s11 + $0x18] sm:$0xff]  ;;  %v257_v30 = vld [vmem:[%s782_s11 + $0x10] sm:$0xff]  ;;  %v256_v32 = vld [vmem:[%s782_s11 + $0x8] sm:$0xff]  ;;  %s207_s12 = scalar_lea.vmem %s856_s3, %s497_s30 }
  0x37   : > { %516 = vmatpush3.msra.mxu0 %v266_v12  ;;  %v271_v33 = vld [vmem:[%s782_s11 + $0x80] sm:$0xff] }
  0x38   : > { %517 = vmatprep.subr.mxu0 %v281_v13  ;;  %v255_v34 = vld [vmem:[%s782_s11] sm:$0xff] }
  0x39   : > { %518 = vmatpush3.msra.mxu0 %v265_v14  ;;  %v234_v36 = vld [vmem:[%s788_s26] sm:$0xff] }
  0x3a   : > { %519 = vmatprep.subr.mxu0 %v280_v15  ;;  %v216_v37 = vld [vmem:[%s796_s4] sm:$0xff] }
  0x3b   : > { %520 = vmatpush3.msra.mxu0 %v264_v16 }
  0x3c   : > { %521 = vmatprep.subr.mxu0 %v279_v17 }
  0x3d   : > { %522 = vmatpush3.msra.mxu0 %v263_v18 }
  0x3e   : > { %523 = vmatprep.subr.mxu0 %v278_v19 }
  0x3f   : > { %524 = vmatpush3.msra.mxu0 %v262_v20 }
  0x40   : > { %525 = vmatprep.subr.mxu0 %v277_v21 }
  0x41   : > { %526 = vmatpush3.msra.mxu0 %v261_v22 }
  0x42   : > { %527 = vmatprep.subr.mxu0 %v276_v23 }
  0x43   : > { %528 = vmatpush3.msra.mxu0 %v260_v24 }
  0x44   : > { %529 = vmatprep.subr.mxu0 %v275_v25 }
  0x45   : > { %530 = vmatpush3.msra.mxu0 %v259_v26 }
  0x46   : > { %531 = vmatprep.subr.mxu0 %v274_v27 }
  0x47   : > { %532 = vmatpush3.msra.mxu0 %v258_v28 }
  0x48   : > { %533 = vmatprep.subr.mxu0 %v273_v29 }
  0x49   : > { %534 = vmatpush3.msra.mxu0 %v257_v30 }
  0x4a   : > { %535 = vmatprep.subr.mxu0 %v272_v31 }
  0x4b   : > { %536 = vmatpush3.msra.mxu0 %v256_v32 }
  0x4c   : > { %537 = vmatprep.subr.mxu0 %v271_v33 }
  0x4d   : > { %538 = vmatpush3.msra.mxu0 %v255_v34 }
  0x9f   : > { %v604_v35 = vpop.permute.xlu0 %603 }
  0xa0   : > { %v606_v38 = vunpack.i.h.bf16 %v604_v35  ;;  %v605_v39 = vunpack.i.l.bf16 %v604_v35 }
  0xa2   : > { %v254_v40 = vsel %vm252_vm0, %v234_v36, %v605_v39  ;;  %v253_v41 = vsel %vm252_vm0, %v216_v37, %v606_v38 }
  0xa3   : > { %351 = vmatprep.mubr.f32.mxu0 %v254_v40 }
  0xa4   : > { %352 = vmatmul.mubr.f32.vlgmr.msra.gmra.mxu0 %v253_v41 }
 0x164   : > { %v539_v42 = vpop.f32.mrf.mxu0 }
 0x166   : > { %v540_v43 = vpop.f32.mrf.mxu0 }
 0x167   : > { %v541_v44 = vadd.f32 %v540_v43, %v539_v42 }
 0x169   : > { %357 = vst [vmem:[%s207_s12] sm:$0xff] %v541_v44 }
 0x16a PF: > { %s19_s22 = sadd.s32 1, %s675_s22   ;;  %s860_s13 = sld [smem:[#allocation5_spill]] }
 0x16b   : > { %p16_p0 = scmp.ge.s32.totalorder %s19_s22, 114   ;;  %s861_s17 = smov %s663_s0 }
 0x16c   : > { %s862_s18 = smov %s667_s20  ;;  %s863_s19 = smov %s671_s21 }
 0x16d   : > { %s864_s0 = smov %s868_s23  ;;  %s865_s20 = smov %s872_s24 }
 0x16e   :  { %18 = sbr.rel (!%p16_p0) target bundleno = 19 (0x13), region = 65 }
 0x170   : > { %s866_s21 = smov %s860_s13 }

</bundles_post_ra>
